<compile_context>
chip_gen: v5e
topology: v5e:2x2
jax: 0.10.0
libtpu: 0.0.40
codegen_flags: <defaults>
</compile_context>

<pallas_src>
import functools

import jax
import jax.numpy as jnp
import numpy as np
from jax.experimental import pallas as pl
from jax.experimental.pallas import tpu as pltpu


# ----------------------------------------------------------------------------
# Host-side glue: separable bilinear interpolation weights (half-pixel centers,
# torchvision / align_corners=False convention).  Pure numpy, compile-time.
# torchvision resize(antialias=True) degenerates to plain bilinear when
# UPsampling, so this is exact for the upscaling case.
# ----------------------------------------------------------------------------
def bilinear_weights_np(out_size: int, in_size: int) -> np.ndarray:
    scale = in_size / out_size
    dst = np.arange(out_size, dtype=np.float64)
    src = np.clip((dst + 0.5) * scale - 0.5, 0.0, in_size - 1.0)
    lo = np.floor(src).astype(np.int64)
    hi = np.minimum(lo + 1, in_size - 1)
    frac = src - lo
    w = np.zeros((out_size, in_size), np.float64)
    rows = np.arange(out_size)
    np.add.at(w, (rows, lo), 1.0 - frac)
    np.add.at(w, (rows, hi), frac)
    return w.astype(np.float32)


# ----------------------------------------------------------------------------
# Pallas kernel (single invocation, whole arrays resident in VMEM):
#   x_ref     : (B, Cx, Hs*Ws)      pass-through high-res channels
#   low_ref   : (NBP, Hl*Wl + 1)    low-res rows (padded to 8) + constant-1 col
#   wkt_ref   : (Hl*Wl + 1, Hs*Ws)  [2*kron(Wh,Ww)^T ; -1 row]
#   noise_ref : (NBP, Hs*Ws)        gaussian conditioning-augmentation noise
#   coef_ref  : (NBP, 2)            col0 = sqrt(ac)[s], col1 = sqrt(1-ac)[s]
#   out_ref   : (B, Cx+Cl, Hs*Ws)   [x channels | augmented low-res channels]
# ----------------------------------------------------------------------------
def _preproc_kernel(x_ref, low_ref, wkt_ref, noise_ref, coef_ref, out_ref,
                    *, B, Cx, Cl):
    hw = out_ref.shape[-1]
    # One MXU dot: the constant-1 column x (-1) row folds the *2-1 normalize,
    # so norm = 2 * bilinear_resize(low) - 1, lane-dense (last dim = Hs*Ws).
    norm = jnp.dot(low_ref[...], wkt_ref[...],
                   preferred_element_type=jnp.float32)          # (NBP, HW)
    sa = coef_ref[:, 0:1]                                       # (NBP, 1)
    sb = coef_ref[:, 1:2]
    # q_sample: sa * x0 + sb * noise   (x0 = norm)
    aug = sa * norm + sb * noise_ref[...]                       # (NBP, HW)
    # Write the combined output: pass-through x channels + aug channels.
    out_ref[:, :Cx, :] = x_ref[...].astype(out_ref.dtype)
    out_ref[:, Cx:, :] = aug[:B * Cl].reshape(B, Cl, hw).astype(out_ref.dtype)


# ----------------------------------------------------------------------------
# Wrapper
# ----------------------------------------------------------------------------
def input_preprocessor(x, low_res, noise, sqrt_ac_s, sqrt_1mac_s):
    """x: (B,Cx,Hs,Ws); low_res: (B,Cl,Hl,Wl) in [0,1]; noise: (B,Cl,Hs,Ws);
    sqrt_ac_s / sqrt_1mac_s: (B,) per-batch q_sample coefficients."""
    B, Cx, Hs, Ws = x.shape
    Bl, Cl, Hl, Wl = low_res.shape
    assert B == Bl
    # antialias=True == plain bilinear only holds when upsampling.
    assert Hs >= Hl and Ws >= Wl, "kernel only supports upscaling resize"

    HW = Hs * Ws
    K = Hl * Wl
    NB = B * Cl
    NBP = max(8, ((NB + 7) // 8) * 8)          # pad rows to f32 sublane multiple

    # Resize operator (numpy, compile-time constant): flattened bilinear resize
    # = kron(Wh, Ww); the *2 and the appended -1 row fold normalize(-1..1).
    wh = bilinear_weights_np(Hs, Hl)                       # (Hs, Hl)
    ww = bilinear_weights_np(Ws, Wl)                       # (Ws, Wl)
    wkt = (2.0 * np.kron(wh, ww)).T.astype(np.float32)     # (K, HW)
    wkt1 = jnp.asarray(
        np.concatenate([wkt, -np.ones((1, HW), np.float32)], axis=0))  # (K+1, HW)

    x3 = x.reshape(B, Cx, HW)

    low_flat = low_res.reshape(NB, K).astype(jnp.float32)
    lowp = jnp.zeros((NBP, K + 1), jnp.float32)
    lowp = lowp.at[:NB, :K].set(low_flat)
    lowp = lowp.at[:NB, K].set(1.0)                        # constant-1 column

    noisep = jnp.zeros((NBP, HW), jnp.float32)
    noisep = noisep.at[:NB].set(noise.reshape(NB, HW).astype(jnp.float32))

    sa = jnp.repeat(sqrt_ac_s.astype(jnp.float32), Cl)     # (NB,)
    sb = jnp.repeat(sqrt_1mac_s.astype(jnp.float32), Cl)
    coefp = jnp.zeros((NBP, 2), jnp.float32)
    coefp = coefp.at[:NB, 0].set(sa).at[:NB, 1].set(sb)

    vmem = pl.BlockSpec(memory_space=pltpu.MemorySpace.VMEM)
    out = pl.pallas_call(
        functools.partial(_preproc_kernel, B=B, Cx=Cx, Cl=Cl),
        out_shape=jax.ShapeDtypeStruct((B, Cx + Cl, HW), x.dtype),
        in_specs=[vmem, vmem, vmem, vmem, vmem],
        out_specs=vmem,
    )(x3, lowp, wkt1, noisep, coefp)

    return out.reshape(B, Cx + Cl, Hs, Ws)


# ----------------------------------------------------------------------------
# Pure-numpy (float64) reference of the same forward pass.
# ----------------------------------------------------------------------------
def reference_forward_np(x, low_res, noise, sa, sb):
    x = np.asarray(x, np.float64)
    low_res = np.asarray(low_res, np.float64)
    noise = np.asarray(noise, np.float64)
    sa = np.asarray(sa, np.float64)
    sb = np.asarray(sb, np.float64)
    _, _, Hs, Ws = x.shape
    _, _, Hl, Wl = low_res.shape
    wh = bilinear_weights_np(Hs, Hl).astype(np.float64)
    ww = bilinear_weights_np(Ws, Wl).astype(np.float64)
    up = np.einsum('hj,bcjk->bchk', wh, low_res)
    up = np.einsum('bchk,wk->bchw', up, ww)
    up = up * 2.0 - 1.0
    aug = sa[:, None, None, None] * up + sb[:, None, None, None] * noise
    return np.concatenate([x, aug], axis=1)


if __name__ == "__main__":
    # Shapes consistent with the module:
    #   low_resolution_size = 8, super_resolution_size = 16, is_spatial=True,
    #   apply_gaussian_conditioning_augmentation = True
    B, Cx, Cl = 2, 4, 3
    LOW, SUPER = 8, 16
    STEPS = 1000

    key = jax.random.PRNGKey(0)
    kx, klow, knoise, ks = jax.random.split(key, 4)

    x = jax.random.normal(kx, (B, Cx, SUPER, SUPER), dtype=jnp.float32)
    low_res_images = jax.random.uniform(klow, (B, Cl, LOW, LOW),
                                        dtype=jnp.float32)      # in [0, 1]
    noise = jax.random.normal(knoise, (B, Cl, SUPER, SUPER), dtype=jnp.float32)

    # Deterministic synthetic DDPM noise scheduler (linear betas) -- glue.
    # TODO(synk): noise_scheduler / context-dict dispatch has no Pallas
    # equivalent; the schedule gather is host/XLA glue, only q_sample math is
    # in-kernel.
    betas = np.linspace(1e-4, 0.02, STEPS, dtype=np.float64)
    alphas_cumprod = np.cumprod(1.0 - betas)
    sqrt_ac = np.sqrt(alphas_cumprod).astype(np.float32)
    sqrt_1mac = np.sqrt(1.0 - alphas_cumprod).astype(np.float32)

    # noise_scheduler.sample_random_times(batch_size=B) -> s  (glue)
    s = jax.random.randint(ks, (B,), 0, STEPS)
    s_np = np.asarray(s)
    sa = jnp.asarray(sqrt_ac[s_np])        # (B,)
    sb = jnp.asarray(sqrt_1mac[s_np])      # (B,)

    out = input_preprocessor(x, low_res_images, noise, sa, sb)
    out = jax.block_until_ready(out)

    ref = reference_forward_np(x, low_res_images, noise, sa, sb)
    np.testing.assert_allclose(np.asarray(out), ref, rtol=1e-4, atol=1e-4)
    assert out.shape == (B, Cx + Cl, SUPER, SUPER)
    print("KERNEL_OK")
</pallas_src>

<mosaic_0001>
module attributes {stable_mosaic.version = 11 : i64} {
  func.func @_preproc_kernel(%arg0: memref<2x4x256xf32, #tpu.memory_space<vmem>>, %arg1: memref<8x65xf32, #tpu.memory_space<vmem>>, %arg2: memref<65x256xf32, #tpu.memory_space<vmem>>, %arg3: memref<8x256xf32, #tpu.memory_space<vmem>>, %arg4: memref<8x2xf32, #tpu.memory_space<vmem>>, %arg5: memref<2x7x256xf32, #tpu.memory_space<vmem>>) attributes {dimension_semantics = [], scalar_prefetch = 0 : i64, scratch_operands = 0 : i64, tpu.core_type = #tpu.core_type<tc>} {
    %c0 = arith.constant 0 : index
    %c0_0 = arith.constant 0 : index
    %0 = vector.load %arg1[%c0, %c0_0] : memref<8x65xf32, #tpu.memory_space<vmem>>, vector<8x65xf32>
    %c0_1 = arith.constant 0 : index
    %c0_2 = arith.constant 0 : index
    %1 = vector.load %arg2[%c0_1, %c0_2] : memref<65x256xf32, #tpu.memory_space<vmem>>, vector<65x256xf32>
    %cst = arith.constant dense<0.000000e+00> : vector<8x256xf32>
    %2 = tpu.matmul %0, %1, %cst {dimension_numbers = #tpu.dot_dimension_numbers<[1], [0], [0], [1], [0, 0, 1, 1], [], []>} : vector<8x65xf32>, vector<65x256xf32>, vector<8x256xf32> -> vector<8x256xf32>
    %c0_3 = arith.constant 0 : index
    %c0_4 = arith.constant 0 : index
    %3 = vector.load %arg4[%c0_3, %c0_4] : memref<8x2xf32, #tpu.memory_space<vmem>>, vector<8x1xf32>
    %c0_5 = arith.constant 0 : index
    %c1 = arith.constant 1 : index
    %4 = vector.load %arg4[%c0_5, %c1] : memref<8x2xf32, #tpu.memory_space<vmem>>, vector<8x1xf32>
    %5 = vector.broadcast %3 : vector<8x1xf32> to vector<8x256xf32>
    %6 = arith.mulf %5, %2 : vector<8x256xf32>
    %c0_6 = arith.constant 0 : index
    %c0_7 = arith.constant 0 : index
    %7 = vector.load %arg3[%c0_6, %c0_7] : memref<8x256xf32, #tpu.memory_space<vmem>>, vector<8x256xf32>
    %8 = vector.broadcast %4 : vector<8x1xf32> to vector<8x256xf32>
    %9 = arith.mulf %8, %7 : vector<8x256xf32>
    %10 = arith.addf %6, %9 : vector<8x256xf32>
    %c0_8 = arith.constant 0 : index
    %c0_9 = arith.constant 0 : index
    %c0_10 = arith.constant 0 : index
    %11 = vector.load %arg0[%c0_8, %c0_9, %c0_10] : memref<2x4x256xf32, #tpu.memory_space<vmem>>, vector<2x4x256xf32>
    %c0_11 = arith.constant 0 : index
    %c0_12 = arith.constant 0 : index
    %c0_13 = arith.constant 0 : index
    %12 = vector.load %arg5[%c0_11, %c0_12, %c0_13] : memref<2x7x256xf32, #tpu.memory_space<vmem>>, vector<2x4x256xf32>
    tpu.vector_store %arg5[%c0_11, %c0_12, %c0_13], %11 {strides = array<i32>} : memref<2x7x256xf32, #tpu.memory_space<vmem>>, vector<2x4x256xf32>,
    %13 = vector.extract_strided_slice %10 {offsets = [0, 0], sizes = [6, 256], strides = [1, 1]} : vector<8x256xf32> to vector<6x256xf32>
    %14 = vector.shape_cast %13 : vector<6x256xf32> to vector<2x3x256xf32>
    %c0_14 = arith.constant 0 : index
    %c4 = arith.constant 4 : index
    %c0_15 = arith.constant 0 : index
    %15 = vector.load %arg5[%c0_14, %c4, %c0_15] : memref<2x7x256xf32, #tpu.memory_space<vmem>>, vector<2x3x256xf32>
    tpu.vector_store %arg5[%c0_14, %c4, %c0_15], %14 {strides = array<i32>} : memref<2x7x256xf32, #tpu.memory_space<vmem>>, vector<2x3x256xf32>,
    return
  }
}

</mosaic_0001>

<bundles_post_ra>
// kernel: tpu_custom_call.1
= control target key start
LH: loop header
LB: loop body
LE: loop exit
PB: predicated region body
PF: predicated region fallthrough
CT: control target
= control target key end

     0   :  { %10 = vsyncpa [#allocation3], 0  ;;  %s390_s0 = inlined_call_operand.hbm [shape: f32[2,4,256], index: 0, kind: input, shape index: {}]   ;;  %s391_s1 = inlined_call_operand.vmem [shape: f32[8,65], index: 1, kind: input, shape index: {}]   ;;  %s392_s2 = inlined_call_operand.hbm [shape: f32[65,256], index: 2, kind: input, shape index: {}]   ;;  %s393_s3 = inlined_call_operand.hbm [shape: f32[8,256], index: 3, kind: input, shape index: {}]   ;;  %s394_s4 = inlined_call_operand.vmem [shape: f32[8,2], index: 4, kind: input, shape index: {}]   ;;  %s395_s5 = inlined_call_operand.vmem [shape: f32[2,7,256], index: 5, kind: output, shape index: {}]  }
   0x1   :  { %11 = vsyncpa [#allocation5], 0  ;;  %s31_s20 = sshll.u32 %s392_s2, 4  ;;  %s309_s21 = smov [#allocation4]   ;;  %s32_s20 = int_to_ptr.hbm [resolvable:$true] %s31_s20 }
   0x2   :  { %s33_s22 = sshll.u32 %s309_s21, 4  ;;  %s16_s25 = sshll.u32 %s390_s0, 4  ;;  %s34_s22 = int_to_ptr.vmem [resolvable:$true] %s33_s22  ;;  %s17_s25 = int_to_ptr.hbm [resolvable:$true] %s16_s25 }
   0x3   :  { %s310_s26 = smov 256   ;;  %s311_s27 = smov 16  }
   0x4   :  { %39 = dma.hbm_to_vmem [thread:$0]  %s32_s20, 2304, %s34_s22, [#allocation5], %s310_s26, %s310_s26, %s311_s27  }
   0x5   :  { %s312_s28 = smov [#allocation2]   ;;  %s313_s30 = smov 128  }
   0x6   :  { %s18_s29 = sshll.u32 %s312_s28, 4  ;;  %s314_s6 = smov 8   ;;  %s19_s29 = int_to_ptr.vmem [resolvable:$true] %s18_s29 }
   0x7   :  { %24 = dma.hbm_to_vmem [thread:$0]  %s17_s25, 256, %s19_s29, [#allocation3], %s313_s30, %s313_s30, %s314_s6  }
   0x8   :  { %s45_s8 = sshll.u32 %s393_s3, 4  ;;  %s315_s9 = smov [#allocation6]   ;;  %s46_s8 = int_to_ptr.hbm [resolvable:$true] %s45_s8 }
   0x9   :  { %s47_s10 = sshll.u32 %s315_s9, 4  ;;  %s48_s10 = int_to_ptr.vmem [resolvable:$true] %s47_s10 }
   0xa   :  { %50 = dma.hbm_to_vmem [thread:$0]  %s46_s8, 256, %s48_s10, [#allocation5]  }
   0xb   :  { %305 = dma.done.wait [#allocation3], 256  }
   0xc   :  { %306 = vsyncadd [#allocation3], 4294967040 }
   0xd   :  { %307 = dma.done.wait [#allocation5], 2560  }
   0xe   :  { %308 = vsyncadd [#allocation5], 4294964736  ;;  %v316_v0 = vmov 0   ;;  %vm88_vm0 = vcmask 1040384   ;;  %v82_v1 = vld [vmem:[#allocation4 + $0x80] sm:$0x1] }
   0xf   :  { %231 = vset.pattern.permute.xlu0 %v316_v0  ;;  %v83_v2 = vld [vmem:[#allocation4 + $0x88] sm:$0x1]  ;;  %v80_v3 = vld [vmem:[#allocation4 + $0x70] sm:$0xff]  ;;  %218 = vmatpush.msk.msra.mxu0 %vm88_vm0, %v82_v1  ;;  %v81_v4 = vld [vmem:[#allocation4 + $0x78] sm:$0xff]  ;;  %vm84_vm1 = vcmask 531456   ;;  %v317_v21 = vmov 1  }
  0x10   :  { %220 = vmatpush.msk.msra.mxu1 %vm88_vm0, %v83_v2  ;;  %v78_v5 = vld [vmem:[#allocation4 + $0x60] sm:$0xff]  ;;  %v79_v6 = vld [vmem:[#allocation4 + $0x68] sm:$0xff]  ;;  %v76_v7 = vld [vmem:[#allocation4 + $0x50] sm:$0xff]  ;;  %vm176_vm2 = vcmask 1041409   ;;  %vm179_vm3 = vcmask 1042434   ;;  %vm182_vm4 = vcmask 1043459  }
  0x11   :  { %103 = vmatpush.msra.mxu0 %v80_v3  ;;  %v77_v8 = vld [vmem:[#allocation4 + $0x58] sm:$0xff]  ;;  %v74_v9 = vld [vmem:[#allocation4 + $0x40] sm:$0xff]  ;;  %v75_v10 = vld [vmem:[#allocation4 + $0x48] sm:$0xff]  ;;  %vm185_vm5 = vcmask 1044484   ;;  %vm188_vm6 = vcmask 1045509  }
  0x12   :  { %123 = vmatpush.msra.mxu1 %v81_v4  ;;  %v135_v11 = vld [vmem:[%s394_s4] sm:$0xff]  ;;  %v72_v12 = vld [vmem:[#allocation4 + $0x30] sm:$0xff]  ;;  %v73_v13 = vld [vmem:[#allocation4 + $0x38] sm:$0xff] }
  0x13   :  { %104 = vmatpush.msra.mxu0 %v78_v5  ;;  %138 = vperm.xlu0 %231, %v135_v11   ;;  %v70_v14 = vld [vmem:[#allocation4 + $0x20] sm:$0xff]  ;;  %v71_v15 = vld [vmem:[#allocation4 + $0x28] sm:$0xff]  ;;  %v68_v16 = vld [vmem:[#allocation4 + $0x10] sm:$0xff] }
  0x14   :  { %124 = vmatpush.msra.mxu1 %v79_v6  ;;  %v69_v17 = vld [vmem:[#allocation4 + $0x18] sm:$0xff]  ;;  %v66_v18 = vld [vmem:[#allocation4] sm:$0xff]  ;;  %v67_v19 = vld [vmem:[#allocation4 + $0x8] sm:$0xff] }
  0x15   :  { %105 = vmatpush.msra.mxu0 %v76_v7  ;;  %v65_v20 = vld [vmem:[%s391_s1] sm:$0xff]  ;;  %v153_v22 = vld [vmem:[#allocation2] sm:$0xff]  ;;  %v154_v23 = vld [vmem:[#allocation2 + $0x8] sm:$0xff] }
  0x16   :  { %125 = vmatpush.msra.mxu1 %v77_v8  ;;  %157 = vst [vmem:[#allocation1] ss:$2 sm:$0xff] %v153_v22  ;;  %v144_v29 = vld [vmem:[#allocation6 + $0x8] sm:$0xff]  ;;  %v143_v31 = vld [vmem:[#allocation6] sm:$0xff] }
  0x17   :  { %106 = vmatpush.msra.mxu0 %v74_v9  ;;  %161 = vst [vmem:[#allocation1 + $0x10] ss:$2 sm:$0xff] %v154_v23 }
  0x18   :  { %126 = vmatpush.msra.mxu1 %v75_v10 }
  0x19   :  { %107 = vmatpush.msra.mxu0 %v72_v12 }
  0x1a   :  { %127 = vmatpush.msra.mxu1 %v73_v13 }
  0x1b   :  { %108 = vmatpush.msra.mxu0 %v70_v14  ;;  %232 = vset.pattern.permute.xlu0 %v317_v21 }
  0x1c   :  { %128 = vmatpush.msra.mxu1 %v71_v15  ;;  %146 = vperm.xlu0 %232, %v135_v11  }
  0x1d   :  { %109 = vmatpush.msra.mxu0 %v68_v16  ;;  %v158_v24 = vld.sshfl [vmem:[#allocation1] sm:$0xff pattern:$0x75316420]  ;;  %v159_v25 = vld.sshfl [vmem:[#allocation1 + $0x8] sm:$0xff pattern:$0x75316420] }
  0x1e   :  { %129 = vmatpush.msra.mxu1 %v69_v17  ;;  %168 = vst [vmem:[%s395_s5] sm:$0xf] %v158_v24  ;;  %v162_v26 = vld.sshfl [vmem:[#allocation1 + $0x10] sm:$0xff pattern:$0x75316420] }
  0x1f   :  { %110 = vmatpush.msra.mxu0 %v66_v18  ;;  %169 = vst [vmem:[%s395_s5 + $0x8] sm:$0xf] %v159_v25  ;;  %v163_v27 = vld.sshfl [vmem:[#allocation1 + $0x18] sm:$0xff pattern:$0x75316420] }
  0x20   :  { %130 = vmatpush.msra.mxu1 %v67_v19  ;;  %219 = vmatmul.msk.f32.vlgmr.msra.gmra.mxu0 %vm84_vm1, %v65_v20  ;;  %170 = vst [vmem:[%s395_s5 + $0x10] sm:$0xf] %v162_v26 }
  0x21   :  { %221 = vmatmul.msk.f32.vlgmr.msra.gmra.mxu1 %vm84_vm1, %v65_v20  ;;  %171 = vst [vmem:[%s395_s5 + $0x18] sm:$0xf] %v163_v27 }
  0x85   :  { %v139_v28 = vpop.permute.xlu0 %138 }
  0x8e   :  { %v147_v30 = vpop.permute.xlu0 %146 }
  0x8f   :  { %v150_v32 = vmul.f32 %v147_v30, %v144_v29  ;;  %v149_v35 = vmul.f32 %v147_v30, %v143_v31 }
  0x9d   :  { %v112_v33 = vpop.f32.mrf.mxu0 }
  0x9e   :  { %v132_v34 = vpop.f32.mrf.mxu1  ;;  %v141_v36 = vmul.f32 %v139_v28, %v112_v33 }
  0x9f   :  { %v142_v37 = vmul.f32 %v139_v28, %v132_v34 }
  0xa0   :  { %v151_v39 = vadd.f32 %v149_v35, %v141_v36 }
  0xa1   :  { %v152_v38 = vadd.f32 %v150_v32, %v142_v37 }
  0xa3   :  { %v174_v40 = vrot.slane %v152_v38, 7 }
  0xa5   :  { %v175_v41 = vsel %vm88_vm0, %v151_v39, %v174_v40  ;;  %v177_v42 = vsel %vm176_vm2, %v151_v39, %v174_v40  ;;  %v180_v43 = vsel %vm179_vm3, %v151_v39, %v174_v40  ;;  %v183_v46 = vsel %vm182_vm4, %v151_v39, %v174_v40 }
  0xa6   :  { %v178_v44 = vrot.slane %v177_v42, 1  ;;  %v181_v45 = vrot.slane %v180_v43, 2  ;;  %192 = vst [vmem:[#allocation1 + $0x4] ss:$9 sm:$0xff] %v175_v41  ;;  %v186_v47 = vsel %vm185_vm5, %v151_v39, %v174_v40  ;;  %v189_v48 = vsel %vm188_vm6, %v151_v39, %v174_v40 }
  0xa7   :  { %v184_v49 = vrot.slane %v183_v46, 3  ;;  %v187_v50 = vrot.slane %v186_v47, 4  ;;  %v190_v53 = vrot.slane %v189_v48, 5 }
  0xa8   :  { %194 = vst [vmem:[#allocation1 + $0x5] ss:$9 sm:$0xff] %v178_v44 }
  0xa9   :  { %196 = vst [vmem:[#allocation1 + $0x6] ss:$9 sm:$0xff] %v181_v45 }
  0xb0   :  { %v197_v51 = vld [vmem:[#allocation1] sm:$0xff]  ;;  %v198_v52 = vld [vmem:[#allocation1 + $0x9] sm:$0xff] }
  0xb1   :  { %199 = vst [vmem:[#allocation1 + $0x4] ss:$9 sm:$0xff] %v184_v49 }
  0xb2   :  { %200 = vst [vmem:[#allocation1 + $0x5] ss:$9 sm:$0xff] %v187_v50 }
  0xb3   :  { %201 = vst [vmem:[#allocation1 + $0x6] ss:$9 sm:$0xff] %v190_v53 }
  0xb4   :  { %208 = vst [vmem:[%s395_s5] sm:$0x70] %v197_v51 }
  0xb5   :  { %209 = vst [vmem:[%s395_s5 + $0x8] sm:$0x70] %v198_v52 }
  0xba   :  { %v202_v54 = vld [vmem:[#allocation1] sm:$0xff]  ;;  %v203_v55 = vld [vmem:[#allocation1 + $0x9] sm:$0xff] }
  0xbb   :  { %210 = vst [vmem:[%s395_s5 + $0x10] sm:$0x70] %v202_v54 }
  0xbc   :  { %211 = vst [vmem:[%s395_s5 + $0x18] sm:$0x70] %v203_v55 }
  0xbd   :  { %216 = vsyncpa [#allocation3], 1 }
  0xbe   :  { %217 = vsyncpa [#allocation5], 1 }

</bundles_post_ra>
